<compile_context>
chip_gen: v7x
topology: tpu7x:2x2x1
jax: 0.10.0
libtpu: 0.0.40
codegen_flags: <defaults>
</compile_context>

<pallas_src>
import math
import jax
import jax.numpy as jnp
from jax.experimental import pallas as pl
from jax.experimental.pallas import tpu as pltpu

# ---- module constants ----
NUM_FRAMES = 5          # max_len in the PyTorch module
D_MODEL = 32            # embedding dim for the example
DROPOUT_P = 0.1         # identity at inference


def make_pe(max_len: int, d_model: int) -> jnp.ndarray:
    """Sinusoidal positional-encoding table, identical to the PyTorch buffer (even d_model)."""
    position = jnp.arange(max_len, dtype=jnp.float32)[:, None]                 # (L, 1)
    div_term = jnp.exp(jnp.arange(0, d_model, 2, dtype=jnp.float32)
                       * (-math.log(10000.0) / d_model))                       # (ceil(D/2),)
    sin_vals = jnp.sin(position * div_term)                                    # (L, ceil(D/2))
    cos_vals = jnp.cos(position * div_term)[:, : d_model // 2]                 # (L, D//2)
    pe = jnp.zeros((max_len, d_model), jnp.float32)
    pe = pe.at[:, 0::2].set(sin_vals)
    pe = pe.at[:, 1::2].set(cos_vals)
    return pe


# ============================ Pallas kernel ============================

def _add_pe_kernel(x_ref, pe_ref, o_ref):
    # x_ref: (tb, ts, D)   pe_ref: (ts, D) -> broadcast add over the batch-tile rows.
    # Upcast to f32 for the add (v5e VALU has no bf16), cast back on store.
    x = x_ref[...].astype(jnp.float32)
    pe = pe_ref[...].astype(jnp.float32)
    o_ref[...] = (x + pe[None, :, :]).astype(o_ref.dtype)


def _choose_tiles(B: int, S: int, D: int, itemsize: int):
    """Pick (tb, ts) so each x/out tile stays within a modest VMEM budget (~2 MiB).

    2 x (x + out) double-buffers + the resident pe tile then stay well under the
    default scoped-VMEM limit on v5e/v6e/v7x, while tiles remain multi-hundred-KiB
    to multi-MiB at production shapes (not per-step-overhead bound).
    """
    budget = 2 * 1024 * 1024  # bytes per x/out tile
    row_bytes = S * D * itemsize
    if row_bytes <= budget:
        tb = max(1, min(B, budget // row_bytes))
        while B % tb:             # keep a clean grid (tb divides B)
            tb -= 1
        return tb, S
    # One batch row already exceeds the budget: tile the seq axis too.
    # Only legal when the trailing (seq, d_model) dims obey the (8, 128) rule.
    if D % 128 == 0 and S % 8 == 0:
        ts = max(8, (budget // (D * itemsize)) // 8 * 8)
        ts = min(ts, S)
        while S % ts:
            ts -= 8
        return 1, max(ts, 8)
    # Fallback: full rows (extreme shapes may need a raised vmem limit).
    return 1, S


def positional_encoding(x: jnp.ndarray, pe: jnp.ndarray) -> jnp.ndarray:
    """x: (batch, seq, d_model); pe: (max_len, d_model).  Returns x + pe[:seq]."""
    B, S, D = x.shape
    pe_s = pe[:S].astype(x.dtype)                       # static slice + dtype match
    tb, ts = _choose_tiles(B, S, D, jnp.dtype(x.dtype).itemsize)
    grid = (B // tb, S // ts)

    out = pl.pallas_call(
        _add_pe_kernel,
        grid=grid,
        in_specs=[
            pl.BlockSpec((tb, ts, D), lambda i, j: (i, j, 0)),   # x tile
            pl.BlockSpec((ts, D),     lambda i, j: (j, 0)),      # pe tile: batch-invariant
        ],
        out_specs=pl.BlockSpec((tb, ts, D), lambda i, j: (i, j, 0)),
        out_shape=jax.ShapeDtypeStruct((B, S, D), x.dtype),
        input_output_aliases={0: 0},                    # write result in place over x
        compiler_params=pltpu.CompilerParams(
            dimension_semantics=("parallel", "parallel")),
    )(x, pe_s)

    # dropout(p=0.1) is identity in eval mode.
    return out


# ============================ example / self-test ============================

if __name__ == "__main__":
    key = jax.random.PRNGKey(0)
    B, S, D = 2, NUM_FRAMES, D_MODEL

    pe = make_pe(NUM_FRAMES, D_MODEL)
    fwd = jax.jit(positional_encoding)

    # f32 path (matches the PyTorch module exactly)
    x = jax.random.normal(key, (B, S, D), jnp.float32)
    y = fwd(x, pe)
    jax.block_until_ready(y)
    y_ref = x + pe[:S][None, :, :]
    assert y.shape == (B, S, D) and y.dtype == jnp.float32
    assert bool(jnp.allclose(y, y_ref, atol=1e-6, rtol=1e-6))

    # bf16 path (dtype robustness: pe cast to x.dtype, add in f32, store bf16)
    x_bf = x.astype(jnp.bfloat16)
    y_bf = fwd(x_bf, pe)
    jax.block_until_ready(y_bf)
    y_bf_ref = (x_bf.astype(jnp.float32)
                + pe[:S].astype(jnp.bfloat16).astype(jnp.float32)[None, :, :]
                ).astype(jnp.bfloat16)
    assert y_bf.dtype == jnp.bfloat16
    assert bool(jnp.allclose(y_bf.astype(jnp.float32),
                             y_bf_ref.astype(jnp.float32),
                             atol=1e-2, rtol=1e-2))

    print("KERNEL_OK")
</pallas_src>

<mosaic_0001>
module attributes {stable_mosaic.version = 11 : i64} {
  func.func @_add_pe_kernel(%arg0: i32, %arg1: i32, %arg2: memref<2x5x32xf32, #tpu.memory_space<vmem>>, %arg3: memref<5x32xf32, #tpu.memory_space<vmem>>, %arg4: memref<2x5x32xf32, #tpu.memory_space<vmem>>) attributes {dimension_semantics = [#tpu.dimension_semantics<parallel>, #tpu.dimension_semantics<parallel>], iteration_bounds = array<i64: 1, 1>, scalar_prefetch = 0 : i64, scratch_operands = 0 : i64, tpu.core_type = #tpu.core_type<tc>, window_params = [{transform_indices = @transform_0, window_bounds = array<i64: 2, 5, 32>}, {transform_indices = @transform_1, window_bounds = array<i64: 5, 32>}, {transform_indices = @transform_2, window_bounds = array<i64: 2, 5, 32>}]} {
    %c0 = arith.constant 0 : index
    %c0_0 = arith.constant 0 : index
    %c0_1 = arith.constant 0 : index
    %0 = vector.load %arg2[%c0, %c0_0, %c0_1] : memref<2x5x32xf32, #tpu.memory_space<vmem>>, vector<2x5x32xf32>
    %c0_2 = arith.constant 0 : index
    %c0_3 = arith.constant 0 : index
    %1 = vector.load %arg3[%c0_2, %c0_3] : memref<5x32xf32, #tpu.memory_space<vmem>>, vector<5x32xf32>
    %2 = vector.shape_cast %1 : vector<5x32xf32> to vector<1x5x32xf32>
    %3 = vector.broadcast %2 : vector<1x5x32xf32> to vector<2x5x32xf32>
    %4 = arith.addf %0, %3 : vector<2x5x32xf32>
    %c0_4 = arith.constant 0 : index
    %c0_5 = arith.constant 0 : index
    %c0_6 = arith.constant 0 : index
    %5 = vector.load %arg4[%c0_4, %c0_5, %c0_6] : memref<2x5x32xf32, #tpu.memory_space<vmem>>, vector<2x5x32xf32>
    tpu.vector_store %arg4[%c0_4, %c0_5, %c0_6], %4 {strides = array<i32>} : memref<2x5x32xf32, #tpu.memory_space<vmem>>, vector<2x5x32xf32>,
    return
  }
  func.func @transform_0(%arg0: i32, %arg1: i32) -> (i32, i32, i32) {
    %c0_i32 = arith.constant 0 : i32
    %c0_i32_0 = arith.constant 0 : i32
    return %arg0, %arg1, %c0_i32 : i32, i32, i32
  }
  func.func @transform_1(%arg0: i32, %arg1: i32) -> (i32, i32) {
    %c0_i32 = arith.constant 0 : i32
    %c0_i32_0 = arith.constant 0 : i32
    return %arg1, %c0_i32 : i32, i32
  }
  func.func @transform_2(%arg0: i32, %arg1: i32) -> (i32, i32, i32) {
    %c0_i32 = arith.constant 0 : i32
    %c0_i32_0 = arith.constant 0 : i32
    return %arg0, %arg1, %c0_i32 : i32, i32, i32
  }
}

</mosaic_0001>

<bundles_post_ra>
// kernel: positional_encoding.1
= control target key start
LH: loop header
LB: loop body
LE: loop exit
PB: predicated region body
PF: predicated region fallthrough
CT: control target
= control target key end

     0   :  { %vm16_vm0 = vcmask 258048   ;;  %s53_s0 = inlined_call_operand.vmem [shape: f32[2,5,32], index: 0, kind: input, shape index: {}, may-alias: {0,2}]   ;;  %s54_s1 = inlined_call_operand.vmem [shape: f32[5,32], index: 1, kind: input, shape index: {}]   ;;  %s55_s2 = inlined_call_operand.vmem [shape: f32[2,5,32], index: 2, kind: output, shape index: {}, may-alias: {0,2}]  }
   0x1   :  { %v11_v0 = vld [vmem:[%s53_s0] sm:$0x1f]  ;;  %v12_v2 = vld [vmem:[%s53_s0 + $0x8] sm:$0x1f] }
   0x2   :  { %v13_v1 = vld [vmem:[%s54_s1] sm:$0x1f] }
   0x3   :  { %v14_v3 = vadd.f32 %v13_v1, %v11_v0  ;;  %v15_v4 = vadd.f32 %v13_v1, %v12_v2 }
   0x5   :  { %17 = vst.msk [vmem:[%s55_s2] sm:$0x1f] %vm16_vm0, %v14_v3  ;;  %18 = vst.msk [vmem:[%s55_s2 + $0x8] sm:$0x1f] %vm16_vm0, %v15_v4 }

</bundles_post_ra>
